<compile_context>
chip_gen: v5e
topology: v5e:2x2
jax: 0.10.0
libtpu: 0.0.40
codegen_flags: <defaults>
</compile_context>

<pallas_src>
import jax
import jax.numpy as jnp
from jax.experimental import pallas as pl
from jax.experimental.pallas import tpu as pltpu

HIDDEN = 32
OUT_DIM = 1


def _mlp_kernel(x_ref, w1_ref, b1_ref, w2_ref, b2_ref, o_ref):
    # x tile: (TB, F) in its HBM dtype; cast to the MXU compute dtype in-kernel.
    xb = x_ref[...].astype(w1_ref.dtype)                      # VPU cast (free filler)
    h = jnp.dot(xb, w1_ref[...],
                preferred_element_type=jnp.float32)           # (TB, 32), MXU, f32 acc
    h = jnp.maximum(h + b1_ref[...], 0.0)                     # bias + ReLU on VPU (f32)
    out = jnp.dot(h, w2_ref[...],
                  preferred_element_type=jnp.float32)         # (TB, 1), f32
    o_ref[...] = (out + b2_ref[0]).astype(o_ref.dtype)        # scalar bias from SMEM


def _pick_block_rows(batch, n_features, itemsize, target_bytes=4 << 20):
    """Batch tile: ~target_bytes per x buffer, multiple of 8, clamped to batch."""
    tb = max(8, (target_bytes // max(n_features * itemsize, 1)) // 8 * 8)
    return batch if batch <= tb else tb


def neural_network1_forward(x, w1, b1, w2, b2, *, block_rows=None,
                            compute_dtype=jnp.bfloat16):
    """x: (B, C, H, W) or (B, F). w1: (F, 32), b1: (32,), w2: (32, 1), b2: (1,).
    Returns logits of shape (B, 1), float32."""
    B = x.shape[0]
    x2d = x.reshape(B, -1)                       # nn.Flatten (row-major); no dtype cast
    F = x2d.shape[1]

    if block_rows is None:
        block_rows = _pick_block_rows(B, F, jnp.dtype(x2d.dtype).itemsize)
    TB = int(block_rows)
    grid = (pl.cdiv(B, TB),)

    # Weights/biases are tiny; one-time casts here are negligible and keep the
    # kernel's resident operands in their compute dtypes.
    w1c = w1.astype(compute_dtype)               # (F, 32)  bf16 into the MXU
    b1c = b1.reshape(1, HIDDEN).astype(jnp.float32)
    w2c = w2.astype(jnp.float32)                 # (32, 1)  second matmul in f32
    b2c = b2.reshape(OUT_DIM).astype(jnp.float32)

    out = pl.pallas_call(
        _mlp_kernel,
        out_shape=jax.ShapeDtypeStruct((B, OUT_DIM), jnp.float32),
        grid=grid,
        in_specs=[
            pl.BlockSpec((TB, F), lambda i: (i, 0)),            # streamed activations
            pl.BlockSpec((F, HIDDEN), lambda i: (0, 0)),        # resident weights
            pl.BlockSpec((1, HIDDEN), lambda i: (0, 0)),        # resident bias 1
            pl.BlockSpec((HIDDEN, OUT_DIM), lambda i: (0, 0)),  # resident weights 2
            pl.BlockSpec(memory_space=pltpu.MemorySpace.SMEM),  # scalar bias 2
        ],
        out_specs=pl.BlockSpec((TB, OUT_DIM), lambda i: (i, 0)),
        compiler_params=pltpu.CompilerParams(
            dimension_semantics=("parallel",),   # shard batch tiles across v7x's 2 TCs
        ),
    )(x2d, w1c, b1c, w2c, b2c)
    return out


def init_params(key, n_features, hidden=HIDDEN, out_dim=OUT_DIM):
    """PyTorch-default-style init: U(-1/sqrt(fan_in), 1/sqrt(fan_in)).
    Weights stored as (in, out) so the kernel computes x @ W (same math as
    PyTorch's x @ W.T with W of shape (out, in))."""
    k1, k2, k3, k4 = jax.random.split(key, 4)
    lim1 = 1.0 / jnp.sqrt(float(n_features))
    lim2 = 1.0 / jnp.sqrt(float(hidden))
    w1 = jax.random.uniform(k1, (n_features, hidden), jnp.float32, -lim1, lim1)
    b1 = jax.random.uniform(k2, (hidden,), jnp.float32, -lim1, lim1)
    w2 = jax.random.uniform(k3, (hidden, out_dim), jnp.float32, -lim2, lim2)
    b2 = jax.random.uniform(k4, (out_dim,), jnp.float32, -lim2, lim2)
    return w1, b1, w2, b2


def _ref_forward(x, w1, b1, w2, b2):
    x2d = x.reshape(x.shape[0], -1).astype(jnp.float32)
    return jnp.maximum(x2d @ w1 + b1, 0.0) @ w2 + b2


if __name__ == "__main__":
    key = jax.random.PRNGKey(0)
    kx, kp, kx2 = jax.random.split(key, 3)

    # Small NCHW input: batch=2, channels=4, spatial=4x4 -> N_features = 64
    x = jax.random.normal(kx, (2, 4, 4, 4), dtype=jnp.float32)
    n_features = 4 * 4 * 4
    w1, b1, w2, b2 = init_params(kp, n_features)

    logits = neural_network1_forward(x, w1, b1, w2, b2)
    logits = jax.block_until_ready(logits)
    ref = _ref_forward(x, w1, b1, w2, b2)
    assert logits.shape == (2, 1)
    # bf16 inputs to the first matmul (f32 accumulation) -> relaxed tolerance.
    assert jnp.allclose(logits, ref, atol=3e-2, rtol=3e-2)

    # Second check: exercise the multi-step batch grid + partial last tile.
    xb = jax.random.normal(kx2, (50, n_features), dtype=jnp.float32)
    logits_b = neural_network1_forward(xb, w1, b1, w2, b2, block_rows=16)
    logits_b = jax.block_until_ready(logits_b)
    ref_b = _ref_forward(xb, w1, b1, w2, b2)
    assert logits_b.shape == (50, 1)
    assert jnp.allclose(logits_b, ref_b, atol=3e-2, rtol=3e-2)

    print("KERNEL_OK")
</pallas_src>

<mosaic_0001>
module attributes {stable_mosaic.version = 11 : i64} {
  func.func @_mlp_kernel(%arg0: i32, %arg1: memref<2x64xf32, #tpu.memory_space<vmem>>, %arg2: memref<64x32xbf16, #tpu.memory_space<vmem>>, %arg3: memref<1x32xf32, #tpu.memory_space<vmem>>, %arg4: memref<32x1xf32, #tpu.memory_space<vmem>>, %arg5: memref<1xf32, #tpu.memory_space<smem>>, %arg6: memref<2x1xf32, #tpu.memory_space<vmem>>) attributes {dimension_semantics = [#tpu.dimension_semantics<parallel>], iteration_bounds = array<i64: 1>, scalar_prefetch = 0 : i64, scratch_operands = 0 : i64, tpu.core_type = #tpu.core_type<tc>, window_params = [{transform_indices = @transform_0, window_bounds = array<i64: 2, 64>}, {pipeline_mode = #tpu.pipeline_mode<synchronous>, transform_indices = @transform_1, window_bounds = array<i64: 64, 32>}, {pipeline_mode = #tpu.pipeline_mode<synchronous>, transform_indices = @transform_2, window_bounds = array<i64: 1, 32>}, {pipeline_mode = #tpu.pipeline_mode<synchronous>, transform_indices = @transform_3, window_bounds = array<i64: 32, 1>}, {transform_indices = @transform_4, window_bounds = array<i64: 1>}, {transform_indices = @transform_5, window_bounds = array<i64: 2, 1>}]} {
    %c0 = arith.constant 0 : index
    %c0_0 = arith.constant 0 : index
    %0 = vector.load %arg1[%c0, %c0_0] : memref<2x64xf32, #tpu.memory_space<vmem>>, vector<2x64xf32>
    %1 = arith.truncf %0 : vector<2x64xf32> to vector<2x64xbf16>
    %c0_1 = arith.constant 0 : index
    %c0_2 = arith.constant 0 : index
    %2 = vector.load %arg2[%c0_1, %c0_2] : memref<64x32xbf16, #tpu.memory_space<vmem>>, vector<64x32xbf16>
    %cst = arith.constant dense<0.000000e+00> : vector<2x32xf32>
    %3 = tpu.matmul %1, %2, %cst {dimension_numbers = #tpu.dot_dimension_numbers<[1], [0], [0], [1], [0, 0, 1, 1], [], []>} : vector<2x64xbf16>, vector<64x32xbf16>, vector<2x32xf32> -> vector<2x32xf32>
    %c0_3 = arith.constant 0 : index
    %c0_4 = arith.constant 0 : index
    %4 = vector.load %arg3[%c0_3, %c0_4] : memref<1x32xf32, #tpu.memory_space<vmem>>, vector<1x32xf32>
    %5 = vector.broadcast %4 : vector<1x32xf32> to vector<2x32xf32>
    %6 = arith.addf %3, %5 : vector<2x32xf32>
    %cst_5 = arith.constant 0.000000e+00 : f32
    %7 = vector.broadcast %cst_5 : f32 to vector<2x32xf32>
    %8 = arith.maximumf %6, %7 : vector<2x32xf32>
    %c0_6 = arith.constant 0 : index
    %c0_7 = arith.constant 0 : index
    %9 = vector.load %arg4[%c0_6, %c0_7] : memref<32x1xf32, #tpu.memory_space<vmem>>, vector<32x1xf32>
    %cst_8 = arith.constant dense<0.000000e+00> : vector<2x1xf32>
    %10 = tpu.matmul %8, %9, %cst_8 {dimension_numbers = #tpu.dot_dimension_numbers<[1], [0], [0], [1], [0, 0, 1, 1], [], []>} : vector<2x32xf32>, vector<32x1xf32>, vector<2x1xf32> -> vector<2x1xf32>
    %c0_9 = arith.constant 0 : index
    %11 = memref.load %arg5[%c0_9] : memref<1xf32, #tpu.memory_space<smem>>
    %12 = vector.broadcast %11 : f32 to vector<2x1xf32>
    %13 = arith.addf %10, %12 : vector<2x1xf32>
    %c0_10 = arith.constant 0 : index
    %c0_11 = arith.constant 0 : index
    %14 = vector.load %arg6[%c0_10, %c0_11] : memref<2x1xf32, #tpu.memory_space<vmem>>, vector<2x1xf32>
    tpu.vector_store %arg6[%c0_10, %c0_11], %13 {strides = array<i32>} : memref<2x1xf32, #tpu.memory_space<vmem>>, vector<2x1xf32>,
    return
  }
  func.func @transform_0(%arg0: i32) -> (i32, i32) {
    %c0_i32 = arith.constant 0 : i32
    %c0_i32_0 = arith.constant 0 : i32
    return %arg0, %c0_i32 : i32, i32
  }
  func.func @transform_1(%arg0: i32) -> (i32, i32) {
    %c0_i32 = arith.constant 0 : i32
    %c0_i32_0 = arith.constant 0 : i32
    %c0_i32_1 = arith.constant 0 : i32
    return %c0_i32, %c0_i32_0 : i32, i32
  }
  func.func @transform_2(%arg0: i32) -> (i32, i32) {
    %c0_i32 = arith.constant 0 : i32
    %c0_i32_0 = arith.constant 0 : i32
    %c0_i32_1 = arith.constant 0 : i32
    return %c0_i32, %c0_i32_0 : i32, i32
  }
  func.func @transform_3(%arg0: i32) -> (i32, i32) {
    %c0_i32 = arith.constant 0 : i32
    %c0_i32_0 = arith.constant 0 : i32
    %c0_i32_1 = arith.constant 0 : i32
    return %c0_i32, %c0_i32_0 : i32, i32
  }
  func.func @transform_4(%arg0: i32) -> i32 {
    %c0_i32 = arith.constant 0 : i32
    %c0_i32_0 = arith.constant 0 : i32
    return %c0_i32 : i32
  }
  func.func @transform_5(%arg0: i32) -> (i32, i32) {
    %c0_i32 = arith.constant 0 : i32
    %c0_i32_0 = arith.constant 0 : i32
    return %arg0, %c0_i32 : i32, i32
  }
}

</mosaic_0001>

<bundles_post_ra>
// kernel: tpu_custom_call.1
= control target key start
LH: loop header
LB: loop body
LE: loop exit
PB: predicated region body
PF: predicated region fallthrough
CT: control target
= control target key end

     0   :  { %vm60_vm0 = vcmask 523264   ;;  %vm84_vm1 = vcmask 261120   ;;  %vm108_vm2 = vcmask 1024   ;;  %s203_s1 = inlined_call_operand.vmem [shape: bf16[64,32], index: 1, kind: input, shape index: {}]   ;;  %s204_s3 = inlined_call_operand.vmem [shape: f32[32,1], index: 3, kind: input, shape index: {}]   ;;  %s205_s2 = inlined_call_operand.vmem [shape: f32[1,32], index: 2, kind: input, shape index: {}]   ;;  %s206_s0 = inlined_call_operand.vmem [shape: f32[2,64], index: 0, kind: input, shape index: {}]   ;;  %s207_s4 = inlined_call_operand.<no memory space> [shape: f32[1], index: 4, kind: input, shape index: {}]   ;;  %s208_s5 = inlined_call_operand.vmem [shape: f32[2,1], index: 5, kind: output, shape index: {}]  }
   0x1   :  { %v135_v0 = vld [vmem:[%s203_s1 + $0x18] sm:$0xff]  ;;  %v134_v2 = vld [vmem:[%s203_s1 + $0x10] sm:$0xff]  ;;  %v133_v3 = vld [vmem:[%s203_s1 + $0x8] sm:$0xff]  ;;  %v83_v15 = vstv %s207_s4 }
   0x2   :  { %v81_v1 = vld [vmem:[%s204_s3 + $0x18] sm:$0xff]  ;;  %68 = vmatpush.bf16.msra.mxu0 %v135_v0  ;;  %v132_v4 = vld [vmem:[%s203_s1] sm:$0xff]  ;;  %v80_v7 = vld [vmem:[%s204_s3 + $0x10] sm:$0xff] }
   0x3   :  { %100 = vmatpush.msra.mxu1 %v81_v1  ;;  %v22_v5 = vld [vmem:[%s206_s0] sm:$0x3]  ;;  %v79_v8 = vld [vmem:[%s204_s3 + $0x8] sm:$0xff] }
   0x4   :  { %v23_v6 = vpack.c.bf16 %v22_v5, %v22_v5  ;;  %v78_v9 = vld [vmem:[%s204_s3] sm:$0xff] }
   0x5   :  { %101 = vmatpush.msra.mxu1 %v80_v7  ;;  %v136_v10 = vld [vmem:[%s205_s2] ss:$0 sm:$0xff] }
   0x6   :  { %69 = vmatpush.bf16.msra.mxu0 %v134_v2 }
   0x7   :  { %102 = vmatpush.msra.mxu1 %v79_v8 }
   0x9   :  { %103 = vmatpush.msra.mxu1 %v78_v9 }
   0xa   :  { %70 = vmatpush.bf16.msra.mxu0 %v133_v3 }
   0xe   :  { %71 = vmatpush.bf16.msra.mxu0 %v132_v4 }
  0x11   :  { %130 = vmatmul.msk.bf16.vlgmr.msra.gmra.mxu0 %vm60_vm0, %v23_v6 }
  0x8e   :  { %v73_v11 = vpop.f32.mrf.mxu0 }
  0x8f   :  { %v74_v12 = vadd.f32 %v136_v10, %v73_v11 }
  0x91   :  { %v77_v13 = vmax.f32 %v74_v12, 0.0 }
  0x93   :  { %131 = vmatmul.msk.f32.vlgmr.msra.gmra.mxu1 %vm84_vm1, %v77_v13 }
  0x96   :  { %v75_v14 = vpop.f32.mrf.mxu0 }
 0x110   :  { %v105_v16 = vpop.f32.mrf.mxu1 }
 0x111   :  { %v106_v17 = vadd.f32 %v105_v16, %v83_v15 }
 0x113   :  { %109 = vst.msk [vmem:[%s208_s5] sm:$0x3] %vm108_vm2, %v106_v17 }

</bundles_post_ra>
